<compile_context>
chip_gen: v5e
topology: v5e:2x2
jax: 0.10.0
libtpu: 0.0.40
codegen_flags: <defaults>
</compile_context>

<pallas_src>
import functools
import math

import jax
import jax.numpy as jnp
from jax.experimental import pallas as pl
from jax.experimental.pallas import tpu as pltpu

_EPS = 0.0001
_LANE_CANDIDATES = (1024, 512, 256, 128)   # lane-dense last-dim widths (multiples of 128)
_MIN_STEPS = 4                             # target grid steps for pipelining / 2-TC sharding


def _mse_logits_kernel(logits_ref, target_ref, out_ref, *, compute_dtype):
    x = logits_ref[...].astype(compute_dtype)
    t = target_ref[...].astype(compute_dtype)

    # sigmoid pinned to a single EUP transcendental (tanh), then clamp (2 VPU ops).
    p = 0.5 * jnp.tanh(0.5 * x) + 0.5
    p = jnp.clip(p, _EPS, 1.0 - _EPS)

    # weight = 5*[t==1] + 1*[t==0] + 0*otherwise  (2 compares + 2 selects).
    zero = jnp.zeros_like(t)
    weight = jnp.where(t == 1.0, 5.0, jnp.where(t == 0.0, 1.0, zero))

    # For t==0: (p-t)^2 == p^2, so one squared diff covers both reference branches.
    diff = p - t
    out_ref[...] = (weight * (diff * diff)).astype(out_ref.dtype)


def _device_kind():
    try:
        return jax.devices()[0].device_kind.lower()
    except Exception:  # pragma: no cover - defensive
        return ""


def mse_with_logits_loss(logits, target, *, block_bytes=None, compute_dtype=None,
                         donate_logits=False):
    """Elementwise weighted MSE-with-logits loss (matches the PyTorch module)."""
    assert logits.shape == target.shape, "logits/target shape mismatch"
    orig_shape = logits.shape
    dtype = logits.dtype
    itemsize = jnp.dtype(dtype).itemsize
    total = math.prod(orig_shape) if orig_shape else 1
    if total == 0:
        return jnp.zeros(orig_shape, dtype)

    kind = _device_kind()
    old_gen = any(tag in kind for tag in ("v2", "v3", "v4", "v5"))

    # bf16 compute only on bf16-capable VPU/EUP generations (v6e / v7x).
    if compute_dtype is None:
        compute_dtype = (jnp.bfloat16
                         if (dtype == jnp.bfloat16 and not old_gen) else jnp.float32)

    # Per-operand VMEM budget: 3 operands x 2 pipeline buffers x block_bytes.
    #   4 MiB -> 24 MiB footprint (fits v6e/v7x); 2 MiB -> 12 MiB (safe on v5e too).
    if block_bytes is None:
        block_bytes = (2 if old_gen else 4) * 1024 * 1024

    # --- choose a lane-dense 2-D view of the flat buffer (zero-copy when possible) ---
    lanes = None
    for cand in _LANE_CANDIDATES:
        if total % cand == 0:
            lanes = cand
            break
    if lanes is None:
        # total not a multiple of 128: pad by < 1024 elements to the next 1024 multiple.
        lanes = _LANE_CANDIDATES[0]
        padded_total = pl.cdiv(total, lanes) * lanes
    else:
        padded_total = total
    ragged = padded_total != total

    rows = padded_total // lanes
    sub_mult = max(8, 32 // itemsize)  # f32 -> 8, bf16 -> 16, int8 -> 32

    max_block_rows = max(
        sub_mult, (block_bytes // (lanes * itemsize)) // sub_mult * sub_mult
    )

    if rows <= 2 * sub_mult:
        # Tiny input: one block equal to the full array dims (exempt from (8,128) rule).
        block_rows = rows
    else:
        # Aim for >= _MIN_STEPS grid steps (pipelining + both v7x TCs), cap by VMEM budget.
        target_rows = pl.cdiv(rows, _MIN_STEPS)
        block_rows = (target_rows // sub_mult) * sub_mult
        block_rows = max(sub_mult, min(block_rows, max_block_rows))
    grid_rows = pl.cdiv(rows, block_rows)  # Pallas masks the ragged last row-block.

    lf = jnp.ravel(logits)
    tf = jnp.ravel(target)
    if ragged:
        pad = padded_total - total  # < lanes elements
        lf = jnp.pad(lf, (0, pad))
        tf = jnp.pad(tf, (0, pad))
    lf = lf.reshape(rows, lanes)
    tf = tf.reshape(rows, lanes)

    cost = pl.CostEstimate(
        flops=10 * total,              # ~10 VPU ops / element
        transcendentals=total,         # one tanh / element
        bytes_accessed=3 * total * itemsize,  # 2 reads + 1 write
    )

    cp_kwargs = dict(
        dimension_semantics=("parallel",),
        vmem_limit_bytes=32 * 1024 * 1024,
    )
    if ragged:
        # Cheap first trial per perf review: let XLA fuse the small pad into the
        # kernel's input pipeline instead of materializing a padded copy.
        cp_kwargs["allow_input_fusion"] = [True, True]

    # Aliasing only helps on the no-pad path (otherwise it targets the temp pad buffer).
    io_aliases = {0: 0} if (donate_logits and not ragged) else {}

    kernel = functools.partial(_mse_logits_kernel, compute_dtype=compute_dtype)

    out = pl.pallas_call(
        kernel,
        out_shape=jax.ShapeDtypeStruct((rows, lanes), dtype),
        grid_spec=pltpu.PrefetchScalarGridSpec(
            num_scalar_prefetch=0,
            grid=(grid_rows,),
            in_specs=[
                pl.BlockSpec((block_rows, lanes), lambda i: (i, 0)),
                pl.BlockSpec((block_rows, lanes), lambda i: (i, 0)),
            ],
            out_specs=pl.BlockSpec((block_rows, lanes), lambda i: (i, 0)),
        ),
        compiler_params=pltpu.CompilerParams(**cp_kwargs),
        cost_estimate=cost,
        input_output_aliases=io_aliases,
    )(lf, tf)

    if ragged:
        out = out.reshape(-1)[:total]
    return out.reshape(orig_shape)


def _reference(logits, target):
    inputs = jnp.clip(jax.nn.sigmoid(logits), _EPS, 1.0 - _EPS)
    pos_id = (target == 1.0).astype(logits.dtype)
    neg_id = (target == 0.0).astype(logits.dtype)
    pos_loss = pos_id * (inputs - target) ** 2
    neg_loss = neg_id * inputs ** 2
    return 5.0 * pos_loss + 1.0 * neg_loss


if __name__ == "__main__":
    key = jax.random.PRNGKey(0)
    k1, k2, k3, k4 = jax.random.split(key, 4)

    # NCHW logits/target (segmentation-style); target is a hard 0/1 mask.
    # 2*4*16*16 = 2048 elements -> zero-copy lane-aligned path.
    shape = (2, 4, 16, 16)
    logits = jax.random.normal(k1, shape, dtype=jnp.float32)
    target = (jax.random.uniform(k2, shape) > 0.5).astype(jnp.float32)

    loss = jax.block_until_ready(mse_with_logits_loss(logits, target))
    ref = _reference(logits, target)
    assert loss.shape == shape
    assert jnp.allclose(loss, ref, atol=1e-6, rtol=1e-5), "mismatch vs reference"

    # Ragged shape (total % 128 != 0) with a small block budget so the multi-step
    # tiled + masked-last-block + padded-tail path is also exercised.
    shape2 = (3, 5, 33, 47)
    logits2 = jax.random.normal(k3, shape2, dtype=jnp.float32)
    target2 = (jax.random.uniform(k4, shape2) > 0.5).astype(jnp.float32)
    loss2 = jax.block_until_ready(
        mse_with_logits_loss(logits2, target2, block_bytes=64 * 1024))
    ref2 = _reference(logits2, target2)
    assert loss2.shape == shape2
    assert jnp.allclose(loss2, ref2, atol=1e-6, rtol=1e-5), "mismatch (ragged path)"

    print("KERNEL_OK")
</pallas_src>

<mosaic_0001>
module attributes {stable_mosaic.version = 11 : i64} {
  func.func @_mse_logits_kernel(%arg0: i32, %arg1: memref<2x1024xf32, #tpu.memory_space<vmem>>, %arg2: memref<2x1024xf32, #tpu.memory_space<vmem>>, %arg3: memref<2x1024xf32, #tpu.memory_space<vmem>>) attributes {dimension_semantics = [#tpu.dimension_semantics<parallel>], iteration_bounds = array<i64: 1>, scalar_prefetch = 0 : i64, scratch_operands = 0 : i64, tpu.core_type = #tpu.core_type<tc>, window_params = [{transform_indices = @transform_0, window_bounds = array<i64: 2, 1024>}, {transform_indices = @transform_1, window_bounds = array<i64: 2, 1024>}, {transform_indices = @transform_2, window_bounds = array<i64: 2, 1024>}]} {
    %c0 = arith.constant 0 : index
    %c0_0 = arith.constant 0 : index
    %0 = vector.load %arg1[%c0, %c0_0] : memref<2x1024xf32, #tpu.memory_space<vmem>>, vector<2x1024xf32>
    %c0_1 = arith.constant 0 : index
    %c0_2 = arith.constant 0 : index
    %1 = vector.load %arg2[%c0_1, %c0_2] : memref<2x1024xf32, #tpu.memory_space<vmem>>, vector<2x1024xf32>
    %cst = arith.constant 5.000000e-01 : f32
    %2 = vector.broadcast %cst : f32 to vector<2x1024xf32>
    %3 = arith.mulf %2, %0 : vector<2x1024xf32>
    %4 = math.tanh %3 : vector<2x1024xf32>
    %cst_3 = arith.constant 5.000000e-01 : f32
    %5 = vector.broadcast %cst_3 : f32 to vector<2x1024xf32>
    %6 = arith.mulf %5, %4 : vector<2x1024xf32>
    %cst_4 = arith.constant 5.000000e-01 : f32
    %7 = vector.broadcast %cst_4 : f32 to vector<2x1024xf32>
    %8 = arith.addf %6, %7 : vector<2x1024xf32>
    %cst_5 = arith.constant 9.99999974E-5 : f32
    %cst_6 = arith.constant 0.999899983 : f32
    %9 = vector.broadcast %cst_5 : f32 to vector<2x1024xf32>
    %10 = arith.maximumf %9, %8 : vector<2x1024xf32>
    %11 = vector.broadcast %cst_6 : f32 to vector<2x1024xf32>
    %12 = arith.minimumf %11, %10 : vector<2x1024xf32>
    %cst_7 = arith.constant 0.000000e+00 : f32
    %13 = vector.broadcast %cst_7 : f32 to vector<2x1024xf32>
    %cst_8 = arith.constant 1.000000e+00 : f32
    %14 = vector.broadcast %cst_8 : f32 to vector<2x1024xf32>
    %15 = arith.cmpf oeq, %1, %14 : vector<2x1024xf32>
    %cst_9 = arith.constant 0.000000e+00 : f32
    %16 = vector.broadcast %cst_9 : f32 to vector<2x1024xf32>
    %17 = arith.cmpf oeq, %1, %16 : vector<2x1024xf32>
    %cst_10 = arith.constant 1.000000e+00 : f32
    %18 = vector.broadcast %cst_10 : f32 to vector<2x1024xf32>
    %19 = arith.select %17, %18, %13 : vector<2x1024xi1>, vector<2x1024xf32>
    %cst_11 = arith.constant 5.000000e+00 : f32
    %20 = vector.broadcast %cst_11 : f32 to vector<2x1024xf32>
    %21 = arith.select %15, %20, %19 : vector<2x1024xi1>, vector<2x1024xf32>
    %22 = arith.subf %12, %1 : vector<2x1024xf32>
    %23 = arith.mulf %22, %22 : vector<2x1024xf32>
    %24 = arith.mulf %21, %23 : vector<2x1024xf32>
    %c0_12 = arith.constant 0 : index
    %c0_13 = arith.constant 0 : index
    %25 = vector.load %arg3[%c0_12, %c0_13] : memref<2x1024xf32, #tpu.memory_space<vmem>>, vector<2x1024xf32>
    tpu.vector_store %arg3[%c0_12, %c0_13], %24 {strides = array<i32>} : memref<2x1024xf32, #tpu.memory_space<vmem>>, vector<2x1024xf32>,
    return
  }
  func.func @transform_0(%arg0: i32) -> (i32, i32) {
    %c0_i32 = arith.constant 0 : i32
    %c0_i32_0 = arith.constant 0 : i32
    return %arg0, %c0_i32 : i32, i32
  }
  func.func @transform_1(%arg0: i32) -> (i32, i32) {
    %c0_i32 = arith.constant 0 : i32
    %c0_i32_0 = arith.constant 0 : i32
    return %arg0, %c0_i32 : i32, i32
  }
  func.func @transform_2(%arg0: i32) -> (i32, i32) {
    %c0_i32 = arith.constant 0 : i32
    %c0_i32_0 = arith.constant 0 : i32
    return %arg0, %c0_i32 : i32, i32
  }
}

</mosaic_0001>

<bundles_post_ra>
// kernel: tpu_custom_call.1
= control target key start
LH: loop header
LB: loop body
LE: loop exit
PB: predicated region body
PF: predicated region fallthrough
CT: control target
= control target key end

     0   :  { %7 = vsyncpa [#allocation3], 0  ;;  %s204_s0 = inlined_call_operand.hbm [shape: f32[2,1024], index: 0, kind: input, shape index: {}]   ;;  %s205_s1 = inlined_call_operand.hbm [shape: f32[2,1024], index: 1, kind: input, shape index: {}]   ;;  %s206_s2 = inlined_call_operand.hbm [shape: f32[2,1024], index: 2, kind: output, shape index: {}]  }
   0x1   :  { %8 = vsyncpa [#allocation6], 0 }
   0x2   :  { %9 = vsyncpa [#allocation4], 0  ;;  %s15_s11 = sshll.u32 %s204_s0, 4  ;;  %s176_s12 = smov [#allocation2]   ;;  %s16_s11 = int_to_ptr.hbm [resolvable:$true] %s15_s11 }
   0x3   :  { %s17_s13 = sshll.u32 %s176_s12, 4  ;;  %s26_s16 = sshll.u32 %s205_s1, 4  ;;  %s18_s13 = int_to_ptr.vmem [resolvable:$true] %s17_s13  ;;  %s27_s16 = int_to_ptr.hbm [resolvable:$true] %s26_s16 }
   0x4   :  { %20 = dma.hbm_to_vmem [thread:$0]  %s16_s11, 256, %s18_s13, [#allocation3]  }
   0x5   :  { %s177_s17 = smov [#allocation5]  }
   0x6   :  { %s28_s18 = sshll.u32 %s177_s17, 4  ;;  %s29_s18 = int_to_ptr.vmem [resolvable:$true] %s28_s18 }
   0x7   :  { %31 = dma.hbm_to_vmem [thread:$0]  %s27_s16, 256, %s29_s18, [#allocation6]  }
   0x8   :  { %170 = dma.done.wait [#allocation3], 256  }
   0x9   :  { %171 = vsyncadd [#allocation3], 4294967040 }
   0xa   :  { %172 = dma.done.wait [#allocation6], 256  }
   0xb   :  { %173 = vsyncadd [#allocation6], 4294967040  ;;  %v40_v0 = vld [vmem:[#allocation2] sm:$0xff]  ;;  %v41_v1 = vld [vmem:[#allocation2 + $0x8] sm:$0xff]  ;;  %v178_v15 = vmov 0.0   ;;  %s179_s0 = smov [#allocation7]  }
   0xc   :  { %v44_v2 = vmul.f32 0.5, %v40_v0  ;;  %v45_v3 = vmul.f32 0.5, %v41_v1  ;;  %v42_v6 = vld [vmem:[#allocation5] sm:$0xff]  ;;  %v43_v8 = vld [vmem:[#allocation5 + $0x8] sm:$0xff]  ;;  %s77_s1 = sshll.u32 %s179_s0, 4  ;;  %s79_s21 = sshll.u32 %s206_s2, 4  ;;  %s78_s1 = int_to_ptr.vmem [resolvable:$true] %s77_s1  ;;  %s80_s21 = int_to_ptr.hbm [resolvable:$true] %s79_s21 }
   0xd   :  { %vm58_vm0 = vcmp.eq.f32.partialorder %v42_v6, 0.0  ;;  %vm59_vm1 = vcmp.eq.f32.partialorder %v43_v8, 0.0  ;;  %vm56_vm2 = vcmp.eq.f32.partialorder %v42_v6, 1.0  ;;  %vm57_vm3 = vcmp.eq.f32.partialorder %v43_v8, 1.0 }
   0xe   :  { %94 = vtanh.f32 %v44_v2  ;;  %v60_v16 = vsel %vm58_vm0, 1.0, %v178_v15  ;;  %v61_v18 = vsel %vm59_vm1, 1.0, %v178_v15 }
   0xf   :  { %96 = vtanh.f32 %v45_v3  ;;  %v62_v20 = vsel %vm56_vm2, 5.0, %v60_v16  ;;  %v63_v23 = vsel %vm57_vm3, 5.0, %v61_v18 }
  0x14   :  { %v95_v4 = vpop.eup %94 }
  0x15   :  { %v97_v5 = vpop.eup %96  ;;  %v48_v7 = vmul.f32 0.5, %v95_v4 }
  0x16   :  { %v49_v9 = vmul.f32 0.5, %v97_v5 }
  0x17   :  { %v50_v10 = vadd.f32 0.5, %v48_v7 }
  0x18   :  { %v51_v11 = vadd.f32 0.5, %v49_v9 }
  0x19   :  { %v52_v12 = vmax.f32 %v50_v10, 0.0001 }
  0x1a   :  { %v53_v13 = vmax.f32 %v51_v11, 0.0001 }
  0x1b   :  { %v54_v14 = vmin.f32 %v52_v12, 0.9999 }
  0x1c   :  { %v55_v17 = vmin.f32 %v53_v13, 0.9999 }
  0x1d   :  { %v64_v19 = vsub.f32 %v54_v14, %v42_v6 }
  0x1e   :  { %v65_v21 = vsub.f32 %v55_v17, %v43_v8 }
  0x1f   :  { %v66_v22 = vmul.f32 %v64_v19, %v64_v19 }
  0x20   :  { %v67_v24 = vmul.f32 %v65_v21, %v65_v21 }
  0x21   :  { %v68_v25 = vmul.f32 %v66_v22, %v62_v20 }
  0x22   :  { %v69_v26 = vmul.f32 %v67_v24, %v63_v23 }
  0x23   :  { %70 = vst [vmem:[#allocation7] sm:$0xff] %v68_v25 }
  0x24   :  { %71 = vst [vmem:[#allocation7 + $0x8] sm:$0xff] %v69_v26 }
  0x25   :  { %82 = dma.vmem_to_hbm [thread:$0]  %s78_s1, 256, %s80_s21, [#allocation4]  }
  0x26   :  { %174 = dma.done.wait [#allocation4], 256  }
  0x27   :  { %175 = vsyncadd [#allocation4], 4294967040 }
  0x28   :  { %87 = vsyncpa [#allocation3], 1 }
  0x29   :  { %88 = vsyncpa [#allocation6], 1 }
  0x2a   :  { %89 = vsyncpa [#allocation4], 1 }

</bundles_post_ra>
